<compile_context>
chip_gen: v7x
topology: tpu7x:2x2x1
jax: 0.10.0
libtpu: 0.0.40
codegen_flags: <defaults>
</compile_context>

<pallas_src>
import functools

import jax
import jax.numpy as jnp
from jax.experimental import pallas as pl
from jax.experimental.pallas import tpu as pltpu

_MIB = 1024 * 1024


# ---------------------------------------------------------------------------
# generation-aware VMEM budget
# ---------------------------------------------------------------------------
@functools.lru_cache(maxsize=1)
def _vmem_budget_bytes():
    """~3/4 of per-core VMEM; clamped so it is safe on v5e/v6e (128 MiB) and
    v7x (64 MiB). Falls back to 48 MiB if the query is unavailable."""
    try:
        info = pltpu.get_tpu_info()
        cap = getattr(info, "vmem_capacity_bytes", None)
        if cap:
            return int(min(100 * _MIB, max(40 * _MIB, (int(cap) * 3) // 4)))
    except Exception:  # pragma: no cover - defensive; fallback is always safe
        pass
    return 48 * _MIB


# ---------------------------------------------------------------------------
# tile-size helpers
# ---------------------------------------------------------------------------
def _pick_n_tile(n):
    """Batch tile. The scale is stored (N, C, 1), so the batch dim of every
    block is unconstrained; keep it small and make n_grid >= 2 when N >= 2 so
    the 'parallel' batch axis can be split across v7x's two TensorCores."""
    return max(1, min(8, -(-n // 2)))


def _pick_hw_tile(hw, tile_n, c, itemsize, cap):
    """Lane tile over H*W: a multiple of 128 (<= hw) sized near `cap` bytes.
    Prefers a tile that divides hw exactly; otherwise the ragged tail tile is
    masked inside the reduce kernel."""
    if hw <= 128:
        return hw                                    # full (possibly ragged) dim
    per_lane = max(1, tile_n * c * itemsize)
    budget = max(128, (cap // per_lane) // 128 * 128)
    tile = min((hw // 128) * 128, budget)
    t = tile
    for _ in range(64):                              # prefer an exact divisor
        if t < 128:
            break
        if hw % t == 0:
            return t
        t -= 128
    return tile


# ---------------------------------------------------------------------------
# Fused kernel (block covers the full H*W): one HBM read + one HBM write of x.
#   x (tile_n, C, HW), w1t (C, Cm), w2t (Cm, C) -> out (tile_n, C, HW)
# ---------------------------------------------------------------------------
def _ca_fused_kernel(x_ref, w1_ref, w2_ref, o_ref, *, inv_hw):
    x = x_ref[...]                                    # (tn, C, HW), native dtype
    tn = x.shape[0]

    avg = jnp.sum(x, axis=-1, dtype=jnp.float32) * inv_hw      # (tn, C) f32
    mx = jnp.max(x, axis=-1).astype(jnp.float32)                # (tn, C) f32

    # Stack avg/max along rows -> run the tiny MLP once instead of twice.
    stacked = jnp.concatenate([avg, mx], axis=0)                # (2*tn, C)
    h = jnp.maximum(
        jnp.dot(stacked, w1_ref[...], preferred_element_type=jnp.float32), 0.0)
    m = jnp.dot(h, w2_ref[...], preferred_element_type=jnp.float32)
    scale = jax.nn.sigmoid(m[:tn] + m[tn:])                     # (tn, C) f32

    s = scale.astype(x.dtype)[:, :, None]                       # (tn, C, 1)
    o_ref[...] = (x * s).astype(o_ref.dtype)


# ---------------------------------------------------------------------------
# Tiled path, pass 1: partial sum/max reduction over HW tiles -> (N, C, 1).
#   grid = (N/tile_n, HW/tile_hw); HW axis is the reduction ("arbitrary").
# ---------------------------------------------------------------------------
def _ca_reduce_kernel(x_ref, w1_ref, w2_ref, scale_ref, sum_acc, max_acc, *,
                      inv_hw, hw_len, tile_hw, needs_mask):
    hw_idx = pl.program_id(1)

    @pl.when(hw_idx == 0)
    def _init():
        sum_acc[...] = jnp.zeros_like(sum_acc)
        max_acc[...] = jnp.full_like(max_acc, -jnp.inf)

    x = x_ref[...]                                    # (tn, C, tile_hw)
    if needs_mask:
        lane = jax.lax.broadcasted_iota(jnp.int32, (1, 1, tile_hw), 2)
        valid = (lane + hw_idx * tile_hw) < hw_len
        x_sum = jnp.where(valid, x, jnp.zeros((), x.dtype))
        x_max = jnp.where(valid, x, jnp.full((), -jnp.inf, x.dtype))
    else:
        x_sum = x
        x_max = x

    sum_acc[...] = sum_acc[...] + jnp.sum(x_sum, axis=-1, dtype=jnp.float32)
    max_acc[...] = jnp.maximum(max_acc[...],
                               jnp.max(x_max, axis=-1).astype(jnp.float32))

    @pl.when(hw_idx == pl.num_programs(1) - 1)
    def _finalize():
        avg = sum_acc[...] * inv_hw                   # (tn, C)
        mx = max_acc[...]
        tn = avg.shape[0]
        stacked = jnp.concatenate([avg, mx], axis=0)  # (2*tn, C) -> single MLP
        h = jnp.maximum(
            jnp.dot(stacked, w1_ref[...], preferred_element_type=jnp.float32),
            0.0)
        m = jnp.dot(h, w2_ref[...], preferred_element_type=jnp.float32)
        scale_ref[...] = jax.nn.sigmoid(m[:tn] + m[tn:])[:, :, None]


# ---------------------------------------------------------------------------
# Tiled path, pass 2: lane-dense broadcast-multiply (fully parallel grid).
# ---------------------------------------------------------------------------
def _ca_apply_kernel(scale_ref, x_ref, o_ref):
    x = x_ref[...]                                    # (tn, C, tile_hw)
    s = scale_ref[...].astype(x.dtype)                # (tn, C, 1), pre-shaped
    o_ref[...] = (x * s).astype(o_ref.dtype)


# ---------------------------------------------------------------------------
# Forward wrapper
# ---------------------------------------------------------------------------
@functools.partial(jax.jit, static_argnames=("force_tiled",))
def channel_attention_forward(x, W1, W2, *, force_tiled=False):
    """x: (N, C, H, W); W1: (Cm, C, 3, 3); W2: (C, Cm, 3, 3) (bias=False)."""
    N, C, H, W = x.shape
    HW = H * W
    dtype = x.dtype
    itemsize = dtype.itemsize
    xr = x.reshape(N, C, HW)                          # native dtype, no copy

    # fc1/fc2 act on a 1x1 pooled map with zero padding=1 -> only the center
    # tap of each 3x3 kernel contributes.
    w1t = jnp.transpose(W1[:, :, 1, 1]).astype(jnp.float32)   # (C, Cm)
    w2t = jnp.transpose(W2[:, :, 1, 1]).astype(jnp.float32)   # (Cm, C)
    Cm = w1t.shape[1]

    vmem_limit = _vmem_budget_bytes()
    weight_bytes = 2 * 4 * (w1t.size + w2t.size)      # both weights, double-buffered
    avail = max(4 * _MIB, vmem_limit - weight_bytes - 2 * _MIB)
    fused_cap = avail // 5                            # x in + out, double-buffered
    block_cap = min(16 * _MIB, avail // 6)            # per-tile byte target

    tile_n = _pick_n_tile(N)
    n_grid = pl.cdiv(N, tile_n)
    inv_hw = 1.0 / float(HW)

    # ---- fused fast path: one read + one write of x ----
    fused_block_bytes = tile_n * C * HW * itemsize
    if (not force_tiled) and fused_block_bytes <= fused_cap:
        out = pl.pallas_call(
            functools.partial(_ca_fused_kernel, inv_hw=inv_hw),
            out_shape=jax.ShapeDtypeStruct((N, C, HW), dtype),
            grid=(n_grid,),
            in_specs=[
                pl.BlockSpec((tile_n, C, HW), lambda i: (i, 0, 0)),
                pl.BlockSpec((C, Cm), lambda i: (0, 0)),
                pl.BlockSpec((Cm, C), lambda i: (0, 0)),
            ],
            out_specs=pl.BlockSpec((tile_n, C, HW), lambda i: (i, 0, 0)),
            compiler_params=pltpu.CompilerParams(
                dimension_semantics=("parallel",),
                vmem_limit_bytes=vmem_limit),
            cost_estimate=pl.CostEstimate(
                flops=3 * N * C * HW + 8 * N * C * Cm,
                transcendentals=N * C,
                bytes_accessed=2 * N * C * HW * itemsize + weight_bytes // 2),
        )(xr, w1t, w2t)
        return out.reshape(N, C, H, W)

    # ---- general two-pass tiled pipeline ----
    tile_hw = _pick_hw_tile(HW, tile_n, C, itemsize, block_cap)
    hw_grid = pl.cdiv(HW, tile_hw)
    needs_mask = (HW % tile_hw) != 0

    scale = pl.pallas_call(
        functools.partial(_ca_reduce_kernel, inv_hw=inv_hw, hw_len=HW,
                          tile_hw=tile_hw, needs_mask=needs_mask),
        out_shape=jax.ShapeDtypeStruct((N, C, 1), jnp.float32),
        grid=(n_grid, hw_grid),
        in_specs=[
            pl.BlockSpec((tile_n, C, tile_hw), lambda i, j: (i, 0, j)),
            pl.BlockSpec((C, Cm), lambda i, j: (0, 0)),
            pl.BlockSpec((Cm, C), lambda i, j: (0, 0)),
        ],
        out_specs=pl.BlockSpec((tile_n, C, 1), lambda i, j: (i, 0, 0)),
        scratch_shapes=[
            pltpu.VMEM((tile_n, C), jnp.float32),     # running sum
            pltpu.VMEM((tile_n, C), jnp.float32),     # running max
        ],
        compiler_params=pltpu.CompilerParams(
            dimension_semantics=("parallel", "arbitrary"),
            vmem_limit_bytes=vmem_limit),
        cost_estimate=pl.CostEstimate(
            flops=2 * N * C * HW + 8 * N * C * Cm,
            transcendentals=N * C,
            bytes_accessed=N * C * HW * itemsize + weight_bytes // 2 + N * C * 4),
    )(xr, w1t, w2t)

    out = pl.pallas_call(
        _ca_apply_kernel,
        out_shape=jax.ShapeDtypeStruct((N, C, HW), dtype),
        grid=(n_grid, hw_grid),
        in_specs=[
            pl.BlockSpec((tile_n, C, 1), lambda i, j: (i, 0, 0)),
            pl.BlockSpec((tile_n, C, tile_hw), lambda i, j: (i, 0, j)),
        ],
        out_specs=pl.BlockSpec((tile_n, C, tile_hw), lambda i, j: (i, 0, j)),
        compiler_params=pltpu.CompilerParams(
            dimension_semantics=("parallel", "parallel"),
            vmem_limit_bytes=vmem_limit),
        cost_estimate=pl.CostEstimate(
            flops=N * C * HW, transcendentals=0,
            bytes_accessed=2 * N * C * HW * itemsize + N * C * 4),
    )(scale, xr)
    return out.reshape(N, C, H, W)


# ---------------------------------------------------------------------------
# Pure-JAX reference (verification only)
# ---------------------------------------------------------------------------
def channel_attention_reference(x, W1, W2):
    xf = x.astype(jnp.float32)
    avg = jnp.mean(xf, axis=(2, 3))                   # (N, C)
    mx = jnp.max(xf, axis=(2, 3))                     # (N, C)

    def mlp(v):
        h = jnp.maximum(v @ W1[:, :, 1, 1].T, 0.0)
        return h @ W2[:, :, 1, 1].T

    scale = jax.nn.sigmoid(mlp(avg) + mlp(mx))
    return xf * scale[:, :, None, None]


if __name__ == "__main__":
    def _make(key, n, c, h, w, cm, dtype=jnp.float32):
        k = jax.random.split(key, 3)
        xx = jax.random.normal(k[0], (n, c, h, w), jnp.float32).astype(dtype)
        w1 = 0.1 * jax.random.normal(k[1], (cm, c, 3, 3), jnp.float32)  # fc1.weight
        w2 = 0.1 * jax.random.normal(k[2], (c, cm, 3, 3), jnp.float32)  # fc2.weight
        return xx, w1, w2

    key = jax.random.PRNGKey(0)
    k0, k1, k2 = jax.random.split(key, 3)

    # case 1: aligned shapes (N=2, C=16, 16x16, reduction=8 -> Cm=2)
    x, W1, W2 = _make(k0, 2, 16, 16, 16, 2)
    ref = channel_attention_reference(x, W1, W2)
    out_f = jax.block_until_ready(channel_attention_forward(x, W1, W2))
    out_t = jax.block_until_ready(
        channel_attention_forward(x, W1, W2, force_tiled=True))
    assert jnp.allclose(out_f, ref, rtol=2e-4, atol=2e-4), (
        float(jnp.max(jnp.abs(out_f - ref))))
    assert jnp.allclose(out_t, ref, rtol=2e-4, atol=2e-4), (
        float(jnp.max(jnp.abs(out_t - ref))))

    # case 2: ragged batch and spatial dims (exercises masked tail tiles)
    x, W1, W2 = _make(k1, 3, 16, 15, 15, 2)
    ref = channel_attention_reference(x, W1, W2)
    out_f = jax.block_until_ready(channel_attention_forward(x, W1, W2))
    out_t = jax.block_until_ready(
        channel_attention_forward(x, W1, W2, force_tiled=True))
    assert jnp.allclose(out_f, ref, rtol=2e-4, atol=2e-4), (
        float(jnp.max(jnp.abs(out_f - ref))))
    assert jnp.allclose(out_t, ref, rtol=2e-4, atol=2e-4), (
        float(jnp.max(jnp.abs(out_t - ref))))

    # case 3: bf16 input streams in its native dtype, output is bf16
    xb, W1b, W2b = _make(k2, 2, 16, 16, 16, 2, dtype=jnp.bfloat16)
    refb = channel_attention_reference(xb, W1b, W2b)
    outb = jax.block_until_ready(channel_attention_forward(xb, W1b, W2b))
    assert outb.dtype == jnp.bfloat16
    assert jnp.allclose(outb.astype(jnp.float32), refb, rtol=5e-2, atol=5e-2), (
        float(jnp.max(jnp.abs(outb.astype(jnp.float32) - refb))))

    print("KERNEL_OK")
</pallas_src>

<mosaic_0001>
module attributes {stable_mosaic.version = 11 : i64} {
  func.func @_ca_fused_kernel(%arg0: i32, %arg1: memref<1x16x256xf32, #tpu.memory_space<vmem>>, %arg2: memref<16x2xf32, #tpu.memory_space<vmem>>, %arg3: memref<2x16xf32, #tpu.memory_space<vmem>>, %arg4: memref<1x16x256xf32, #tpu.memory_space<vmem>>) attributes {dimension_semantics = [#tpu.dimension_semantics<parallel>], iteration_bounds = array<i64: 2>, scalar_prefetch = 0 : i64, scratch_operands = 0 : i64, tpu.core_type = #tpu.core_type<tc>, window_params = [{transform_indices = @transform_0, window_bounds = array<i64: 1, 16, 256>}, {pipeline_mode = #tpu.pipeline_mode<synchronous>, transform_indices = @transform_1, window_bounds = array<i64: 16, 2>}, {pipeline_mode = #tpu.pipeline_mode<synchronous>, transform_indices = @transform_2, window_bounds = array<i64: 2, 16>}, {transform_indices = @transform_3, window_bounds = array<i64: 1, 16, 256>}]} {
    %c0 = arith.constant 0 : index
    %c0_0 = arith.constant 0 : index
    %c0_1 = arith.constant 0 : index
    %0 = vector.load %arg1[%c0, %c0_0, %c0_1] : memref<1x16x256xf32, #tpu.memory_space<vmem>>, vector<1x16x256xf32>
    %cst = arith.constant dense<0.000000e+00> : vector<1x16xf32>
    %1 = vector.multi_reduction <add>, %0, %cst [2] : vector<1x16x256xf32> to vector<1x16xf32>
    %cst_2 = arith.constant 3.906250e-03 : f32
    %2 = vector.broadcast %cst_2 : f32 to vector<1x16xf32>
    %3 = arith.mulf %1, %2 : vector<1x16xf32>
    %cst_3 = arith.constant dense<0xFF800000> : vector<1x16xf32>
    %4 = vector.multi_reduction <maximumf>, %0, %cst_3 [2] : vector<1x16x256xf32> to vector<1x16xf32>
    %5 = tpu.concatenate %3, %4 in 0 : vector<1x16xf32>, vector<1x16xf32> -> vector<2x16xf32>
    %c0_4 = arith.constant 0 : index
    %c0_5 = arith.constant 0 : index
    %6 = vector.load %arg2[%c0_4, %c0_5] : memref<16x2xf32, #tpu.memory_space<vmem>>, vector<16x2xf32>
    %cst_6 = arith.constant dense<0.000000e+00> : vector<2x2xf32>
    %7 = tpu.matmul %5, %6, %cst_6 {dimension_numbers = #tpu.dot_dimension_numbers<[1], [0], [0], [1], [0, 0, 1, 1], [], []>} : vector<2x16xf32>, vector<16x2xf32>, vector<2x2xf32> -> vector<2x2xf32>
    %cst_7 = arith.constant 0.000000e+00 : f32
    %8 = vector.broadcast %cst_7 : f32 to vector<2x2xf32>
    %9 = arith.maximumf %7, %8 : vector<2x2xf32>
    %c0_8 = arith.constant 0 : index
    %c0_9 = arith.constant 0 : index
    %10 = vector.load %arg3[%c0_8, %c0_9] : memref<2x16xf32, #tpu.memory_space<vmem>>, vector<2x16xf32>
    %cst_10 = arith.constant dense<0.000000e+00> : vector<2x16xf32>
    %11 = tpu.matmul %9, %10, %cst_10 {dimension_numbers = #tpu.dot_dimension_numbers<[1], [0], [0], [1], [0, 0, 1, 1], [], []>} : vector<2x2xf32>, vector<2x16xf32>, vector<2x16xf32> -> vector<2x16xf32>
    %12 = vector.extract_strided_slice %11 {offsets = [0, 0], sizes = [1, 16], strides = [1, 1]} : vector<2x16xf32> to vector<1x16xf32>
    %13 = vector.extract_strided_slice %11 {offsets = [1, 0], sizes = [1, 16], strides = [1, 1]} : vector<2x16xf32> to vector<1x16xf32>
    %14 = arith.addf %12, %13 : vector<1x16xf32>
    %15 = arith.negf %14 : vector<1x16xf32>
    %16 = math.exp %15 : vector<1x16xf32>
    %cst_11 = arith.constant 1.000000e+00 : f32
    %17 = vector.broadcast %cst_11 : f32 to vector<1x16xf32>
    %18 = arith.addf %17, %16 : vector<1x16xf32>
    %19 = arith.divf %17, %18 : vector<1x16xf32>
    %20 = vector.shape_cast %19 : vector<1x16xf32> to vector<1x16x1xf32>
    %21 = vector.broadcast %20 : vector<1x16x1xf32> to vector<1x16x256xf32>
    %22 = arith.mulf %0, %21 : vector<1x16x256xf32>
    %c0_12 = arith.constant 0 : index
    %c0_13 = arith.constant 0 : index
    %c0_14 = arith.constant 0 : index
    %23 = vector.load %arg4[%c0_12, %c0_13, %c0_14] : memref<1x16x256xf32, #tpu.memory_space<vmem>>, vector<1x16x256xf32>
    tpu.vector_store %arg4[%c0_12, %c0_13, %c0_14], %22 {strides = array<i32>} : memref<1x16x256xf32, #tpu.memory_space<vmem>>, vector<1x16x256xf32>,
    return
  }
  func.func @transform_0(%arg0: i32) -> (i32, i32, i32) {
    %c0_i32 = arith.constant 0 : i32
    %c0_i32_0 = arith.constant 0 : i32
    %c0_i32_1 = arith.constant 0 : i32
    return %arg0, %c0_i32, %c0_i32_0 : i32, i32, i32
  }
  func.func @transform_1(%arg0: i32) -> (i32, i32) {
    %c0_i32 = arith.constant 0 : i32
    %c0_i32_0 = arith.constant 0 : i32
    %c0_i32_1 = arith.constant 0 : i32
    return %c0_i32, %c0_i32_0 : i32, i32
  }
  func.func @transform_2(%arg0: i32) -> (i32, i32) {
    %c0_i32 = arith.constant 0 : i32
    %c0_i32_0 = arith.constant 0 : i32
    %c0_i32_1 = arith.constant 0 : i32
    return %c0_i32, %c0_i32_0 : i32, i32
  }
  func.func @transform_3(%arg0: i32) -> (i32, i32, i32) {
    %c0_i32 = arith.constant 0 : i32
    %c0_i32_0 = arith.constant 0 : i32
    %c0_i32_1 = arith.constant 0 : i32
    return %arg0, %c0_i32, %c0_i32_0 : i32, i32, i32
  }
}

</mosaic_0001>

<bundles_post_ra>
// kernel: channel_attention_forward.1
= control target key start
LH: loop header
LB: loop body
LE: loop exit
PB: predicated region body
PF: predicated region fallthrough
CT: control target
= control target key end

     0   :  { %s542_s12 = smov 0   ;;  %s595_s0 = inlined_call_operand.vmem [shape: f32[2,16,256], index: 0, kind: input, shape index: {}]   ;;  %s596_s1 = inlined_call_operand.vmem [shape: f32[16,2], index: 1, kind: input, shape index: {}]   ;;  %s597_s2 = inlined_call_operand.vmem [shape: f32[2,16], index: 2, kind: input, shape index: {}]   ;;  %s598_s3 = inlined_call_operand.vmem [shape: f32[2,16,256], index: 3, kind: output, shape index: {}]  }
   0x1 LB: > { %s459_s13 = sadd.s32 4294967295, %s517_s12   ;;  %p463_p0 = scmp.ge.s32.totalorder %s517_s12, 1  ;;  %s517_s12 = sphi %s542_s12, %s13_s12  }
   0x2   : > { %p137_p1 = scmp.lt.s32.totalorder %s517_s12, 3 }
   0x4   : > { %p138_p2 = pnand %p463_p0, %p137_p1 }
   0x5   : > { %p161_p3 = scmp.lt.s32.totalorder (!%p138_p2), %s459_s13, 1  ;;  %v219_v8 = vld [vmem:[%s596_s1] sm:$0xff] (!%p138_p2)  ;;  %v220_v9 = vld [vmem:[%s596_s1 + $0x8] sm:$0xff] (!%p138_p2)  ;;  %v519_v11 = vmov (!%p138_p2), 0.0|0.0   ;;  %vm520_vm0 = vmmov (!%p138_p2), 0   ;;  %v521_v12 = vmov (!%p138_p2), 0.0   ;;  %v191_v13 = vlaneseq (!%p138_p2) }
   0x6   : > { %141 = sbr.rel (%p138_p2) target bundleno = 748 (0x2ec), region = 32  ;;  %v494_v10 = vpack.c.bf16 (!%p138_p2), %v220_v9, %v219_v8  ;;  %493 = vmatprep.subr.bf16.mxu0 (!%p138_p2), %v519_v11  ;;  %485 = vmatprep.mubr.msk.f32.mxu0 (!%p138_p2), %vm520_vm0, %v521_v12  ;;  %vm202_vm1 = vcmask (!%p138_p2), 130112   ;;  %vm217_vm2 = vcmask (!%p138_p2), 1040384   ;;  %vm221_vm3 = vcmask (!%p138_p2), 130048   ;;  %v296_v32 = vld [vmem:[%s597_s2] sm:$0x3] (!%p138_p2) }
   0x7   : > { %488 = vmatprep.subr.mxu1 (!%p138_p2), %v521_v12  ;;  %490 = vmatprep.mubr.msk.f32.mxu1 (!%p138_p2), %vm520_vm0, %v521_v12  ;;  %v192_v14 = vand.u32 (!%p138_p2), 127, %v191_v13  ;;  %v194_v16 = vshrl.u32 (!%p138_p2), %v191_v13, 7  ;;  %vm301_vm4 = vcmask (!%p138_p2), 1041408   ;;  %vm297_vm5 = vcmask (!%p138_p2), 15360  }
   0x8   : > { %495 = vmatpush3.bf16.msra.mxu0 (!%p138_p2), %v494_v10  ;;  %489 = vmatpush3.msk.msra.mxu1 (!%p138_p2), %vm301_vm4, %v296_v32 }
   0x9   : > { %v197_v15 = vadd.s32 (!%p138_p2), 4294967288, %v192_v14  ;;  %v195_v20 = vsub.s32 (!%p138_p2), %v192_v14, %v194_v16  ;;  %v387_v43 = vsub.s32 (!%p138_p2), 0, %v194_v16 }
   0xb   : > { %v200_v19 = vsub.s32 (!%p138_p2), %v197_v15, %v194_v16 }
   0xd   : > { %s600_s13 = smov (!%p161_p3, %s459_s13), 1 }
   0xe   : > { %s474_s14 = sshll.u32 %s600_s13, 5 }
   0xf   : > { %s165_s17 = scalar_lea.vmem %s595_s0, %s474_s14  ;;  %s170_s26 = scalar_lea.vmem %s598_s3, %s474_s14 }
  0x10   : > { %v558_v0 = vld [vmem:[%s165_s17] sm:$0xff]  ;;  %v560_v1 = vld [vmem:[%s165_s17 + $0x8] sm:$0xff]  ;;  %v562_v2 = vld [vmem:[%s165_s17 + $0x10] sm:$0xff] }
  0x11   : > { %v183_v3 = vmax.f32 %v558_v0, %v560_v1  ;;  %v175_v4 = vadd.f32 %v560_v1, %v558_v0  ;;  %v568_v5 = vld [vmem:[%s165_s17 + $0x18] sm:$0xff] }
  0x12   : > { %v186_v6 = vmax.f32 %v562_v2, %v568_v5  ;;  %v178_v7 = vadd.f32 %v568_v5, %v562_v2 }
  0x13   : > { %184 = vmax.xlane.f32.xlu1 %v183_v3  ;;  %176 = vadd.xlane.f32.xlu0 %v175_v4 }
  0x17   : > { %187 = vmax.xlane.f32.xlu1 %v186_v6  ;;  %179 = vadd.xlane.f32.xlu0 %v178_v7 }
  0xa0   : > { %v185_v17 = vpop.xlane.xlu1 %184  ;;  %v177_v18 = vpop.xlane.xlu0 %176 }
  0xa1   : > { %v181_v21 = vmul.f32 0.00390625, %v177_v18  ;;  %v210_v26 = vrot.slane %v185_v17, %v195_v20 }
  0xa3   : > { %v196_v27 = vrot.slane %v181_v21, %v195_v20 }
  0xa4   : > { %v188_v22 = vpop.xlane.xlu1 %187  ;;  %v180_v23 = vpop.xlane.xlu0 %179 }
  0xa5   : > { %v214_v24 = vrot.slane %v188_v22, %v200_v19  ;;  %v182_v25 = vmul.f32 0.00390625, %v180_v23 }
  0xa7   : > { %v201_v28 = vrot.slane %v182_v25, %v200_v19  ;;  %v215_v29 = vsel %vm202_vm1, %v214_v24, %v210_v26 }
  0xa9   : > { %v203_v30 = vsel %vm202_vm1, %v201_v28, %v196_v27 }
  0xaa   : > { %v218_v31 = vsel %vm217_vm2, %v203_v30, %v215_v29 }
  0xab   : > { %486 = vmatmul.mubr.msk.f32.vlgmr.msra.gmra.mrb[0].mxu0 %vm221_vm3, %v218_v31 }
 0x17e   : > { %v291_v33 = vpop.f32.mrb[0].mxu0 }
 0x17f   : > { %v295_v34 = vmax.f32 %v291_v33, 0.0  ;;  %v487_v35 = vpop.f32.mrb[1].mxu0 }
 0x181   : > { %491 = vmatmul.mubr.msk.f32.vlgmr.msra.gmra.mrb[0].mxu1 %vm297_vm5, %v295_v34 }
 0x254   : > { %v371_v36 = vpop.f32.mrb[0].mxu1 }
 0x255   : > { %v376_v37 = vrot.slane %v371_v36, 1  ;;  %v492_v38 = vpop.f32.mrb[1].mxu1 }
 0x257   : > { %v378_v39 = vadd.f32 %v376_v37, %v371_v36 }
 0x259   : > { %v471_v40 = vmul.f32 -1.442695, %v378_v39 }
 0x25b   : > { %507 = vpow2.f32 %v471_v40 }
 0x265   : > { %v508_v41 = vpop.eup %507 }
 0x266   : > { %v382_v42 = vadd.f32 1.0, %v508_v41 }
 0x268   : > { %509 = vrcp.f32 %v382_v42 }
 0x272   : > { %v510_v44 = vpop.eup %509 }
 0x273   : > { %v388_v45 = vrot.slane %v510_v44, %v387_v43 }
 0x275   : > { %394 = vbcast.lane.b32.xlu1 %v388_v45, 264  ;;  %390 = vbcast.lane.b32.xlu0 %v388_v45, 256 }
 0x2e7   : > { %v395_v46 = vpop.permute.xlu1 %394  ;;  %v391_v47 = vpop.permute.xlu0 %390 }
 0x2e8   : > { %v398_v48 = vmul.f32 %v395_v46, %v562_v2  ;;  %v399_v49 = vmul.f32 %v395_v46, %v568_v5  ;;  %v396_v50 = vmul.f32 %v391_v47, %v558_v0  ;;  %v397_v51 = vmul.f32 %v391_v47, %v560_v1 }
 0x2ea   : > { %402 = vst [vmem:[%s170_s26 + $0x10] sm:$0xff] %v398_v48  ;;  %403 = vst [vmem:[%s170_s26 + $0x18] sm:$0xff] %v399_v49 }
 0x2eb   : > { %400 = vst [vmem:[%s170_s26] sm:$0xff] %v396_v50  ;;  %401 = vst [vmem:[%s170_s26 + $0x8] sm:$0xff] %v397_v51 }
 0x2ec PF: > { %s13_s12 = sadd.s32 1, %s517_s12  }
 0x2ed   : > { %p10_p4 = scmp.ge.s32.totalorder %s13_s12, 4  }
 0x2ef   :  { %12 = sbr.rel (!%p10_p4) target bundleno = 1 (0x1), region = 62 }

</bundles_post_ra>
